<compile_context>
chip_gen: v5e
topology: v5e:2x2
jax: 0.10.0
libtpu: 0.0.40
codegen_flags: <defaults>
</compile_context>

<pallas_src>
import functools

import jax
import jax.numpy as jnp
from jax.experimental import pallas as pl
from jax.experimental.pallas import tpu as pltpu


# -----------------------------------------------------------------------------
# Pallas kernel: MLP + two CrossLayers + final linear for one tile of T rows.
# Layout: features on sublanes, rows on lanes.
# -----------------------------------------------------------------------------
def pg_rank_kernel(x_ref, w1t_ref, w2t_ref, cross_ref, aux_ref, scal_ref,
                   out_ref, *, sub_lanes):
    F, T = x_ref.shape                     # F = cell_dim + drug_dim
    D = F // 2
    h1 = w1t_ref.shape[0]
    h2 = w2t_ref.shape[0]

    # Resident small operands (constant index_map -> fetched once per tile).
    w1t = w1t_ref[...]                      # (h1, F)  f32
    w2t = w2t_ref[...]                      # (h2, h1) f32
    cross = cross_ref[...]                  # (F, 5)   f32
    wc0_cd, bc0_cd = cross[:, 0:1], cross[:, 1:2]
    wc1_cd, bc1_cd = cross[:, 2:3], cross[:, 3:4]
    wf_cd = cross[:, 4:5]
    aux = aux_ref[...]                      # (hmax, 4) f32
    b1, w1_cos = aux[:h1, 0:1], aux[:h1, 1:2]
    b2, w3f = aux[:h2, 2:3], aux[:h2, 3:4]  # w3f = W3 @ wf_deep (folded)
    scal = scal_ref[...]                    # (1, 8)   f32
    wc0_cos, bc0_cos = scal[0:1, 0:1], scal[0:1, 1:2]
    wc1_cos, bc1_cos = scal[0:1, 2:3], scal[0:1, 3:4]
    wf_ccos, wf_cos1 = scal[0:1, 4:5], scal[0:1, 5:6]
    b_f = scal[0:1, 6:7]                    # = bf + b3 @ wf_deep (folded)

    # Static (unrolled) chunk loop over 128-aligned lane windows: bounds the
    # live f32 working set to ~(F, sub_lanes) per chunk while the grid-level
    # DMA block stays big (tile_rows lanes).
    n_sub = T // sub_lanes
    for c in range(n_sub):
        lo, hi = c * sub_lanes, (c + 1) * sub_lanes
        x = x_ref[:, lo:hi].astype(jnp.float32)                  # (F, sub)
        cell, drug = x[:D, :], x[D:, :]
        cos1 = jnp.sum(cell * drug, axis=0, keepdims=True)       # (1, sub)

        # ---- deep_classifier: Linear -> ReLU -> (Dropout=id) x2 -> Linear ----
        # x0 = [cell|drug|cos1] is never formed: the cos1 column of W1 is a
        # rank-1 term; W3/b3 and wf's D_in segment are folded into w3f / b_f.
        h = jnp.dot(w1t, x, preferred_element_type=jnp.float32)
        h = jnp.maximum(h + w1_cos * cos1 + b1, 0.0)
        h = jnp.dot(w2t, h, preferred_element_type=jnp.float32)
        h = jnp.maximum(h + b2, 0.0)
        deep = jnp.sum(w3f * h, axis=0, keepdims=True)           # (1, sub)

        # ---- CrossLayer 0 (residual folded): c0 = x0*(s0+1) + bc0 ----
        s0p1 = (jnp.sum(wc0_cd * x, axis=0, keepdims=True)
                + wc0_cos * cos1 + 1.0)                          # (1, sub)
        c0_cd = x * s0p1 + bc0_cd
        c0_cos = cos1 * s0p1 + bc0_cos

        # ---- CrossLayer 1: c1 = x0*s1 + bc1 + c0 ----
        s1 = (jnp.sum(wc1_cd * c0_cd, axis=0, keepdims=True)
              + wc1_cos * c0_cos)
        cross_dot = jnp.sum(wf_cd * (x * s1 + bc1_cd + c0_cd),
                            axis=0, keepdims=True)
        c1_cos = cos1 * s1 + bc1_cos + c0_cos

        # ---- final linear over concat(D_in, C_out, cos1), split reductions ----
        out_ref[:, lo:hi] = (deep + cross_dot + wf_ccos * c1_cos
                             + wf_cos1 * cos1 + b_f)             # lane-dense


# -----------------------------------------------------------------------------
# Wrapper glue.
# -----------------------------------------------------------------------------
def _renorm_rows(emb, max_norm=1.0, eps=1e-12):
    """Emulate nn.Embedding(max_norm=1): rescale rows with norm > max_norm."""
    n = jnp.sqrt(jnp.sum(emb * emb, axis=-1, keepdims=True) + eps)
    return emb * jnp.where(n > max_norm, max_norm / n, 1.0)


def _pack_params(params):
    """Pack torch-style params into 5 small resident f32 kernel operands."""
    w1 = jnp.asarray(params["w1"], jnp.float32)
    F = w1.shape[0] - 1                    # cell_dim + drug_dim
    h1 = w1.shape[1]
    w2 = jnp.asarray(params["w2"], jnp.float32)
    h2 = w2.shape[1]
    w3 = jnp.asarray(params["w3"], jnp.float32)
    P = w3.shape[1]
    wf = jnp.asarray(params["wf"], jnp.float32)
    hmax = max(h1, h2)

    w1t = w1[:F, :].T                                            # (h1, F)
    w2t = w2.T                                                   # (h2, h1)
    w3f = w3 @ wf[:P, :]                                         # (h2, 1)

    def col(v, n):
        v = jnp.asarray(v, jnp.float32).reshape(-1)
        return jnp.pad(v, (0, n - v.shape[0]))[:, None]

    # Per-feature column params (cross layers + final-linear C_out segment).
    cross = jnp.concatenate([
        col(params["wc0"][:F, 0], F), col(params["bc0"][0, :F], F),
        col(params["wc1"][:F, 0], F), col(params["bc1"][0, :F], F),
        col(wf[P:P + F, 0], F)], axis=1)                         # (F, 5)

    # Per-hidden-axis column params.
    aux = jnp.concatenate([
        col(params["b1"], hmax), col(w1[F, :], hmax),
        col(params["b2"], hmax), col(w3f, hmax)], axis=1)        # (hmax, 4)

    # Scalar params (b3 folded into the final bias via wf's D_in segment).
    b3f = jnp.sum(jnp.asarray(params["b3"], jnp.float32).reshape(-1)
                  * wf[:P, 0])
    scalars = jnp.array([[params["wc0"][F, 0], params["bc0"][0, F],
                          params["wc1"][F, 0], params["bc1"][0, F],
                          wf[P + F, 0], wf[P + F + 1, 0],
                          params["bf"][0, 0] + b3f, 0.0]], jnp.float32)  # (1,8)
    return w1t, w2t, cross, aux, scalars


def pg_rank_nn_cross_forward(inp, params, *, N, M, cell_dim, drug_dim,
                             tile_rows=1024, sub_lanes=256, use_bf16=True):
    assert cell_dim == drug_dim, "forward requires cell_dim == drug_dim"
    assert sub_lanes % 128 == 0 and tile_rows % sub_lanes == 0
    B = inp.shape[0]
    D = cell_dim
    F = 2 * D
    rows = B * M
    act_dtype = jnp.bfloat16 if use_bf16 else jnp.float32

    cell_emb = _renorm_rows(params["cell_table"][inp[:, 0]])    # (B, D)
    drug_emb = _renorm_rows(params["drug_table"][inp[:, 1:]])   # (B, M, D)

    # Build the transposed activation slab directly in act_dtype (bf16 halves
    # the bytes of the broadcast/transpose/pad passes and of the kernel input
    # stream).  cos1 is never materialized — it is rebuilt inside the kernel.
    cell_T = jnp.broadcast_to(
        cell_emb.astype(act_dtype).T[:, :, None], (D, B, M)).reshape(D, rows)
    drug_T = jnp.transpose(drug_emb.astype(act_dtype), (2, 0, 1)).reshape(D, rows)
    # TODO(synk): for large B*M, pass cell (un-broadcast) and drug as separate
    # kernel inputs over a (batch, drug-tile) grid to remove the Mx cell
    # duplication in the HBM stream.
    x_cd = jnp.concatenate([cell_T, drug_T], axis=0)             # (F, rows)

    # Lane-tile sizing: big (default 1024) to amortize the ~0.35us/step
    # pipeline overhead, clamped so tiny inputs don't over-pad.  The in-kernel
    # sub-chunk loop keeps the vreg working set bounded regardless of tile.
    rows_sub = pl.cdiv(rows, sub_lanes) * sub_lanes
    eff_tile = max(sub_lanes, min(tile_rows, rows_sub))
    eff_tile = (eff_tile // sub_lanes) * sub_lanes
    rows_pad = pl.cdiv(rows, eff_tile) * eff_tile
    if rows_pad != rows:
        x_cd = jnp.pad(x_cd, ((0, 0), (0, rows_pad - rows)))
    num_tiles = rows_pad // eff_tile

    w1t, w2t, cross, aux, scalars = _pack_params(params)

    const = lambda a: pl.BlockSpec(a.shape, lambda i: (0, 0))
    kernel = functools.partial(pg_rank_kernel, sub_lanes=sub_lanes)

    out = pl.pallas_call(
        kernel,
        out_shape=jax.ShapeDtypeStruct((1, rows_pad), jnp.float32),
        grid_spec=pltpu.PrefetchScalarGridSpec(
            num_scalar_prefetch=0,
            grid=(num_tiles,),
            in_specs=[pl.BlockSpec((F, eff_tile), lambda i: (0, i)),
                      const(w1t), const(w2t), const(cross), const(aux),
                      const(scalars)],
            out_specs=pl.BlockSpec((1, eff_tile), lambda i: (0, i)),
        ),
        compiler_params=pltpu.CompilerParams(
            dimension_semantics=("parallel",)),
    )(x_cd, w1t, w2t, cross, aux, scalars)

    return out[0, :rows].reshape(B, M, 1)


# -----------------------------------------------------------------------------
# Pure-JAX reference (mirrors the PyTorch forward) for correctness checking.
# -----------------------------------------------------------------------------
def reference_forward(inp, params, *, N, M, cell_dim, drug_dim):
    B = inp.shape[0]
    total_dim = cell_dim + drug_dim + 1
    cell_emb = _renorm_rows(params["cell_table"][inp[:, 0]])
    cell_embs = jnp.broadcast_to(cell_emb[:, None, :], (B, M, cell_dim))
    drug_emb = _renorm_rows(params["drug_table"][inp[:, 1:]])
    cos1 = jnp.sum(cell_embs * drug_emb, axis=2, keepdims=True)
    x0 = jnp.concatenate([cell_embs, drug_emb, cos1], axis=2)

    h = jnp.maximum(x0 @ params["w1"] + params["b1"], 0.0)
    h = jnp.maximum(h @ params["w2"] + params["b2"], 0.0)
    d_in = h @ params["w3"] + params["b3"]

    x0f = x0.reshape(B * M, total_dim)
    c0 = x0f * (x0f @ params["wc0"]) + params["bc0"] + x0f
    c1 = x0f * (c0 @ params["wc1"]) + params["bc1"] + c0
    c_out = c1.reshape(B, M, total_dim)

    feat = jnp.concatenate([d_in, c_out, cos1], axis=2)
    return feat @ params["wf"] + params["bf"]


# -----------------------------------------------------------------------------
# Deterministic parameter construction (synthetic init; orthogonal like torch).
# -----------------------------------------------------------------------------
def make_params(key, *, N, M, cell_dim, drug_dim, hidden_sizes, deep_out_size):
    total_dim = cell_dim + drug_dim + 1
    out_dim = deep_out_size + total_dim + 1
    ks = jax.random.split(key, 16)
    ortho = jax.nn.initializers.orthogonal()
    u = lambda k, shape, lo, hi: jax.random.uniform(k, shape, jnp.float32, lo, hi)

    h1, h2 = hidden_sizes
    return {
        "cell_table": jax.random.normal(ks[0], (N, cell_dim), jnp.float32),
        "drug_table": jax.random.normal(ks[1], (M, drug_dim), jnp.float32),
        # deep_classifier (Linear weights stored as (in, out))
        "w1": ortho(ks[2], (total_dim, h1), jnp.float32),
        "b1": u(ks[3], (1, h1), -0.1, 0.1),
        "w2": ortho(ks[4], (h1, h2), jnp.float32),
        "b2": u(ks[5], (1, h2), -0.1, 0.1),
        "w3": ortho(ks[6], (h2, deep_out_size), jnp.float32),
        "b3": u(ks[7], (1, deep_out_size), -0.1, 0.1),
        # CrossLayers (weight as column vector, bias as row vector)
        "wc0": u(ks[8], (total_dim, 1), -1.0, 1.0),
        "bc0": u(ks[9], (1, total_dim), -1.0, 1.0),
        "wc1": u(ks[10], (total_dim, 1), -1.0, 1.0),
        "bc1": u(ks[11], (1, total_dim), -1.0, 1.0),
        # final classifier
        "wf": ortho(ks[12], (out_dim, 1), jnp.float32),
        "bf": u(ks[13], (1, 1), -0.1, 0.1),
    }


if __name__ == "__main__":
    # Small, module-consistent shapes.
    N = 6            # number of cell lines (cell vocab)
    M = 8            # number of drugs (drug vocab == drugs per row)
    cell_dim = 16
    drug_dim = 16    # must equal cell_dim (elementwise product in forward)
    hidden_sizes = [32, 32]   # deep_layers = 2
    deep_out_size = 8
    B = 2

    key = jax.random.PRNGKey(0)
    kp, kc, kd = jax.random.split(key, 3)
    params = make_params(kp, N=N, M=M, cell_dim=cell_dim, drug_dim=drug_dim,
                         hidden_sizes=hidden_sizes, deep_out_size=deep_out_size)

    cell_idx = jax.random.randint(kc, (B, 1), 0, N, dtype=jnp.int32)
    drug_idx = jax.random.randint(kd, (B, M), 0, M, dtype=jnp.int32)
    inp = jnp.concatenate([cell_idx, drug_idx], axis=1)   # (B, 1+M) int32

    ref = reference_forward(inp, params, N=N, M=M, cell_dim=cell_dim,
                            drug_dim=drug_dim)

    # f32 activation stream: tight check against the reference.
    fwd_f32 = jax.jit(functools.partial(
        pg_rank_nn_cross_forward, N=N, M=M, cell_dim=cell_dim,
        drug_dim=drug_dim, use_bf16=False))
    out_f32 = jax.block_until_ready(fwd_f32(inp, params))
    assert out_f32.shape == (B, M, 1), out_f32.shape
    assert jnp.allclose(out_f32, ref, atol=1e-4, rtol=1e-4), (
        f"f32 max abs err = {jnp.max(jnp.abs(out_f32 - ref))}")

    # bf16 activation-stream path (halves x HBM bytes; all in-kernel math and
    # MXU dots remain f32, so only input quantization error remains).
    fwd_bf16 = jax.jit(functools.partial(
        pg_rank_nn_cross_forward, N=N, M=M, cell_dim=cell_dim,
        drug_dim=drug_dim, use_bf16=True))
    out_bf16 = jax.block_until_ready(fwd_bf16(inp, params))
    assert out_bf16.shape == (B, M, 1), out_bf16.shape
    assert jnp.allclose(out_bf16, ref, atol=1e-1, rtol=1e-1), (
        f"bf16 max abs err = {jnp.max(jnp.abs(out_bf16 - ref))}")

    print("KERNEL_OK")
</pallas_src>

<mosaic_0001>
module attributes {stable_mosaic.version = 11 : i64} {
  func.func @pg_rank_kernel(%arg0: i32, %arg1: memref<32x256xf32, #tpu.memory_space<vmem>>, %arg2: memref<32x32xf32, #tpu.memory_space<vmem>>, %arg3: memref<32x32xf32, #tpu.memory_space<vmem>>, %arg4: memref<32x5xf32, #tpu.memory_space<vmem>>, %arg5: memref<32x4xf32, #tpu.memory_space<vmem>>, %arg6: memref<1x8xf32, #tpu.memory_space<vmem>>, %arg7: memref<1x256xf32, #tpu.memory_space<vmem>>) attributes {dimension_semantics = [#tpu.dimension_semantics<parallel>], iteration_bounds = array<i64: 1>, scalar_prefetch = 0 : i64, scratch_operands = 0 : i64, tpu.core_type = #tpu.core_type<tc>, window_params = [{transform_indices = @transform_0, window_bounds = array<i64: 32, 256>}, {pipeline_mode = #tpu.pipeline_mode<synchronous>, transform_indices = @transform_1, window_bounds = array<i64: 32, 32>}, {pipeline_mode = #tpu.pipeline_mode<synchronous>, transform_indices = @transform_2, window_bounds = array<i64: 32, 32>}, {pipeline_mode = #tpu.pipeline_mode<synchronous>, transform_indices = @transform_3, window_bounds = array<i64: 32, 5>}, {pipeline_mode = #tpu.pipeline_mode<synchronous>, transform_indices = @transform_4, window_bounds = array<i64: 32, 4>}, {pipeline_mode = #tpu.pipeline_mode<synchronous>, transform_indices = @transform_5, window_bounds = array<i64: 1, 8>}, {transform_indices = @transform_6, window_bounds = array<i64: 1, 256>}]} {
    %c0 = arith.constant 0 : index
    %c0_0 = arith.constant 0 : index
    %0 = vector.load %arg2[%c0, %c0_0] : memref<32x32xf32, #tpu.memory_space<vmem>>, vector<32x32xf32>
    %c0_1 = arith.constant 0 : index
    %c0_2 = arith.constant 0 : index
    %1 = vector.load %arg3[%c0_1, %c0_2] : memref<32x32xf32, #tpu.memory_space<vmem>>, vector<32x32xf32>
    %c0_3 = arith.constant 0 : index
    %c0_4 = arith.constant 0 : index
    %2 = vector.load %arg4[%c0_3, %c0_4] : memref<32x5xf32, #tpu.memory_space<vmem>>, vector<32x5xf32>
    %3 = vector.extract_strided_slice %2 {offsets = [0, 0], sizes = [32, 1], strides = [1, 1]} : vector<32x5xf32> to vector<32x1xf32>
    %4 = vector.extract_strided_slice %2 {offsets = [0, 1], sizes = [32, 1], strides = [1, 1]} : vector<32x5xf32> to vector<32x1xf32>
    %5 = vector.extract_strided_slice %2 {offsets = [0, 2], sizes = [32, 1], strides = [1, 1]} : vector<32x5xf32> to vector<32x1xf32>
    %6 = vector.extract_strided_slice %2 {offsets = [0, 3], sizes = [32, 1], strides = [1, 1]} : vector<32x5xf32> to vector<32x1xf32>
    %7 = vector.extract_strided_slice %2 {offsets = [0, 4], sizes = [32, 1], strides = [1, 1]} : vector<32x5xf32> to vector<32x1xf32>
    %c0_5 = arith.constant 0 : index
    %c0_6 = arith.constant 0 : index
    %8 = vector.load %arg5[%c0_5, %c0_6] : memref<32x4xf32, #tpu.memory_space<vmem>>, vector<32x4xf32>
    %9 = vector.extract_strided_slice %8 {offsets = [0, 0], sizes = [32, 1], strides = [1, 1]} : vector<32x4xf32> to vector<32x1xf32>
    %10 = vector.extract_strided_slice %8 {offsets = [0, 1], sizes = [32, 1], strides = [1, 1]} : vector<32x4xf32> to vector<32x1xf32>
    %11 = vector.extract_strided_slice %8 {offsets = [0, 2], sizes = [32, 1], strides = [1, 1]} : vector<32x4xf32> to vector<32x1xf32>
    %12 = vector.extract_strided_slice %8 {offsets = [0, 3], sizes = [32, 1], strides = [1, 1]} : vector<32x4xf32> to vector<32x1xf32>
    %c0_7 = arith.constant 0 : index
    %c0_8 = arith.constant 0 : index
    %13 = vector.load %arg6[%c0_7, %c0_8] : memref<1x8xf32, #tpu.memory_space<vmem>>, vector<1x8xf32>
    %14 = vector.extract_strided_slice %13 {offsets = [0, 0], sizes = [1, 1], strides = [1, 1]} : vector<1x8xf32> to vector<1x1xf32>
    %15 = vector.extract_strided_slice %13 {offsets = [0, 1], sizes = [1, 1], strides = [1, 1]} : vector<1x8xf32> to vector<1x1xf32>
    %16 = vector.extract_strided_slice %13 {offsets = [0, 2], sizes = [1, 1], strides = [1, 1]} : vector<1x8xf32> to vector<1x1xf32>
    %17 = vector.extract_strided_slice %13 {offsets = [0, 3], sizes = [1, 1], strides = [1, 1]} : vector<1x8xf32> to vector<1x1xf32>
    %18 = vector.extract_strided_slice %13 {offsets = [0, 4], sizes = [1, 1], strides = [1, 1]} : vector<1x8xf32> to vector<1x1xf32>
    %19 = vector.extract_strided_slice %13 {offsets = [0, 5], sizes = [1, 1], strides = [1, 1]} : vector<1x8xf32> to vector<1x1xf32>
    %20 = vector.extract_strided_slice %13 {offsets = [0, 6], sizes = [1, 1], strides = [1, 1]} : vector<1x8xf32> to vector<1x1xf32>
    %c0_9 = arith.constant 0 : index
    %c0_10 = arith.constant 0 : index
    %21 = vector.load %arg1[%c0_9, %c0_10] : memref<32x256xf32, #tpu.memory_space<vmem>>, vector<32x256xf32>
    %22 = vector.extract_strided_slice %21 {offsets = [0, 0], sizes = [16, 256], strides = [1, 1]} : vector<32x256xf32> to vector<16x256xf32>
    %23 = vector.extract_strided_slice %21 {offsets = [16, 0], sizes = [16, 256], strides = [1, 1]} : vector<32x256xf32> to vector<16x256xf32>
    %24 = arith.mulf %22, %23 : vector<16x256xf32>
    %cst = arith.constant dense<0.000000e+00> : vector<256xf32>
    %25 = vector.multi_reduction <add>, %24, %cst [0] : vector<16x256xf32> to vector<256xf32>
    %26 = vector.shape_cast %25 : vector<256xf32> to vector<1x256xf32>
    %cst_11 = arith.constant dense<0.000000e+00> : vector<32x256xf32>
    %27 = tpu.matmul %0, %21, %cst_11 {dimension_numbers = #tpu.dot_dimension_numbers<[1], [0], [0], [1], [0, 0, 1, 1], [], []>} : vector<32x32xf32>, vector<32x256xf32>, vector<32x256xf32> -> vector<32x256xf32>
    %28 = vector.broadcast %10 : vector<32x1xf32> to vector<32x256xf32>
    %29 = vector.broadcast %26 : vector<1x256xf32> to vector<32x256xf32>
    %30 = arith.mulf %28, %29 : vector<32x256xf32>
    %31 = arith.addf %27, %30 : vector<32x256xf32>
    %32 = vector.broadcast %9 : vector<32x1xf32> to vector<32x256xf32>
    %33 = arith.addf %31, %32 : vector<32x256xf32>
    %cst_12 = arith.constant 0.000000e+00 : f32
    %34 = vector.broadcast %cst_12 : f32 to vector<32x256xf32>
    %35 = arith.maximumf %33, %34 : vector<32x256xf32>
    %cst_13 = arith.constant dense<0.000000e+00> : vector<32x256xf32>
    %36 = tpu.matmul %1, %35, %cst_13 {dimension_numbers = #tpu.dot_dimension_numbers<[1], [0], [0], [1], [0, 0, 1, 1], [], []>} : vector<32x32xf32>, vector<32x256xf32>, vector<32x256xf32> -> vector<32x256xf32>
    %37 = vector.broadcast %11 : vector<32x1xf32> to vector<32x256xf32>
    %38 = arith.addf %36, %37 : vector<32x256xf32>
    %cst_14 = arith.constant 0.000000e+00 : f32
    %39 = vector.broadcast %cst_14 : f32 to vector<32x256xf32>
    %40 = arith.maximumf %38, %39 : vector<32x256xf32>
    %41 = vector.broadcast %12 : vector<32x1xf32> to vector<32x256xf32>
    %42 = arith.mulf %41, %40 : vector<32x256xf32>
    %cst_15 = arith.constant dense<0.000000e+00> : vector<256xf32>
    %43 = vector.multi_reduction <add>, %42, %cst_15 [0] : vector<32x256xf32> to vector<256xf32>
    %44 = vector.shape_cast %43 : vector<256xf32> to vector<1x256xf32>
    %45 = vector.broadcast %3 : vector<32x1xf32> to vector<32x256xf32>
    %46 = arith.mulf %45, %21 : vector<32x256xf32>
    %cst_16 = arith.constant dense<0.000000e+00> : vector<256xf32>
    %47 = vector.multi_reduction <add>, %46, %cst_16 [0] : vector<32x256xf32> to vector<256xf32>
    %48 = vector.shape_cast %47 : vector<256xf32> to vector<1x256xf32>
    %49 = vector.broadcast %14 : vector<1x1xf32> to vector<1x256xf32>
    %50 = arith.mulf %49, %26 : vector<1x256xf32>
    %51 = arith.addf %48, %50 : vector<1x256xf32>
    %cst_17 = arith.constant 1.000000e+00 : f32
    %52 = vector.broadcast %cst_17 : f32 to vector<1x256xf32>
    %53 = arith.addf %51, %52 : vector<1x256xf32>
    %54 = vector.broadcast %53 : vector<1x256xf32> to vector<32x256xf32>
    %55 = arith.mulf %21, %54 : vector<32x256xf32>
    %56 = vector.broadcast %4 : vector<32x1xf32> to vector<32x256xf32>
    %57 = arith.addf %55, %56 : vector<32x256xf32>
    %58 = arith.mulf %26, %53 : vector<1x256xf32>
    %59 = vector.broadcast %15 : vector<1x1xf32> to vector<1x256xf32>
    %60 = arith.addf %58, %59 : vector<1x256xf32>
    %61 = vector.broadcast %5 : vector<32x1xf32> to vector<32x256xf32>
    %62 = arith.mulf %61, %57 : vector<32x256xf32>
    %cst_18 = arith.constant dense<0.000000e+00> : vector<256xf32>
    %63 = vector.multi_reduction <add>, %62, %cst_18 [0] : vector<32x256xf32> to vector<256xf32>
    %64 = vector.shape_cast %63 : vector<256xf32> to vector<1x256xf32>
    %65 = vector.broadcast %16 : vector<1x1xf32> to vector<1x256xf32>
    %66 = arith.mulf %65, %60 : vector<1x256xf32>
    %67 = arith.addf %64, %66 : vector<1x256xf32>
    %68 = vector.broadcast %67 : vector<1x256xf32> to vector<32x256xf32>
    %69 = arith.mulf %21, %68 : vector<32x256xf32>
    %70 = vector.broadcast %6 : vector<32x1xf32> to vector<32x256xf32>
    %71 = arith.addf %69, %70 : vector<32x256xf32>
    %72 = arith.addf %71, %57 : vector<32x256xf32>
    %73 = vector.broadcast %7 : vector<32x1xf32> to vector<32x256xf32>
    %74 = arith.mulf %73, %72 : vector<32x256xf32>
    %cst_19 = arith.constant dense<0.000000e+00> : vector<256xf32>
    %75 = vector.multi_reduction <add>, %74, %cst_19 [0] : vector<32x256xf32> to vector<256xf32>
    %76 = vector.shape_cast %75 : vector<256xf32> to vector<1x256xf32>
    %77 = arith.mulf %26, %67 : vector<1x256xf32>
    %78 = vector.broadcast %17 : vector<1x1xf32> to vector<1x256xf32>
    %79 = arith.addf %77, %78 : vector<1x256xf32>
    %80 = arith.addf %79, %60 : vector<1x256xf32>
    %81 = arith.addf %44, %76 : vector<1x256xf32>
    %82 = vector.broadcast %18 : vector<1x1xf32> to vector<1x256xf32>
    %83 = arith.mulf %82, %80 : vector<1x256xf32>
    %84 = arith.addf %81, %83 : vector<1x256xf32>
    %85 = vector.broadcast %19 : vector<1x1xf32> to vector<1x256xf32>
    %86 = arith.mulf %85, %26 : vector<1x256xf32>
    %87 = arith.addf %84, %86 : vector<1x256xf32>
    %88 = vector.broadcast %20 : vector<1x1xf32> to vector<1x256xf32>
    %89 = arith.addf %87, %88 : vector<1x256xf32>
    %c0_20 = arith.constant 0 : index
    %c0_21 = arith.constant 0 : index
    %90 = vector.load %arg7[%c0_20, %c0_21] : memref<1x256xf32, #tpu.memory_space<vmem>>, vector<1x256xf32>
    tpu.vector_store %arg7[%c0_20, %c0_21], %89 {strides = array<i32>} : memref<1x256xf32, #tpu.memory_space<vmem>>, vector<1x256xf32>,
    return
  }
  func.func @transform_0(%arg0: i32) -> (i32, i32) {
    %c0_i32 = arith.constant 0 : i32
    %c0_i32_0 = arith.constant 0 : i32
    return %c0_i32, %arg0 : i32, i32
  }
  func.func @transform_1(%arg0: i32) -> (i32, i32) {
    %c0_i32 = arith.constant 0 : i32
    %c0_i32_0 = arith.constant 0 : i32
    %c0_i32_1 = arith.constant 0 : i32
    return %c0_i32, %c0_i32_0 : i32, i32
  }
  func.func @transform_2(%arg0: i32) -> (i32, i32) {
    %c0_i32 = arith.constant 0 : i32
    %c0_i32_0 = arith.constant 0 : i32
    %c0_i32_1 = arith.constant 0 : i32
    return %c0_i32, %c0_i32_0 : i32, i32
  }
  func.func @transform_3(%arg0: i32) -> (i32, i32) {
    %c0_i32 = arith.constant 0 : i32
    %c0_i32_0 = arith.constant 0 : i32
    %c0_i32_1 = arith.constant 0 : i32
    return %c0_i32, %c0_i32_0 : i32, i32
  }
  func.func @transform_4(%arg0: i32) -> (i32, i32) {
    %c0_i32 = arith.constant 0 : i32
    %c0_i32_0 = arith.constant 0 : i32
    %c0_i32_1 = arith.constant 0 : i32
    return %c0_i32, %c0_i32_0 : i32, i32
  }
  func.func @transform_5(%arg0: i32) -> (i32, i32) {
    %c0_i32 = arith.constant 0 : i32
    %c0_i32_0 = arith.constant 0 : i32
    %c0_i32_1 = arith.constant 0 : i32
    return %c0_i32, %c0_i32_0 : i32, i32
  }
  func.func @transform_6(%arg0: i32) -> (i32, i32) {
    %c0_i32 = arith.constant 0 : i32
    %c0_i32_0 = arith.constant 0 : i32
    return %c0_i32, %arg0 : i32, i32
  }
}

</mosaic_0001>

<bundles_post_ra>
// kernel: squeeze.31
= control target key start
LH: loop header
LB: loop body
LE: loop exit
PB: predicated region body
PF: predicated region fallthrough
CT: control target
= control target key end

     0   :  { %s80_s0 = inlined_call_operand.vmem [shape: f32[16], index: 0, kind: input, shape index: {}]   ;;  %s81_s1 = inlined_call_operand.hbm [shape: f32[2,8,1], index: 1, kind: output, shape index: {}]  }
   0x1   :  { %v5_v0 = vld [vmem:[%s80_s0] sm:$0x1] }
   0x2   :  { %2 = vsyncpa [#allocation1], 0  ;;  %6 = vst [vmem:[#allocation3] sm:$0x1] %v5_v0  ;;  %vm8_vm0 = vcmask 64512   ;;  %s62_s0 = smov 120  }
   0x3   :  { %s63_s8 = smov [#allocation0]   ;;  %s27_s1 = sshll.u32 %s81_s1, 4  ;;  %s28_s1 = int_to_ptr.hbm [resolvable:$true] %s27_s1 }
   0x4   :  { %s25_s9 = sshll.u32 %s63_s8, 4  ;;  %s26_s9 = int_to_ptr.vmem [resolvable:$true] %s25_s9 }
   0x9   :  { %v10_v1 = vld [vmem:[#allocation3] sm:$0x1]  }
   0xa   :  { %v7_v2 = vld [vmem:[#allocation3] sm:$0x1]   ;;  %11 = vrot.lane.b32.xlu0 %v10_v1, %s62_s0 }
   0xb   :  { %9 = vst.msk [vmem:[#allocation2] sm:$0x1] %vm8_vm0, %v7_v2  }
  0x7c   :  { %v12_v3 = vpop.permute.xlu0 %11  }
  0x7d   :  { %15 = vst.msk [vmem:[#allocation2 + $0x1] sm:$0x1] %vm8_vm0, %v12_v3  }
  0x84   :  { %v18_v4 = vld [vmem:[#allocation2] sm:$0x3] }
  0x85   :  { %21 = vst [vmem:[#allocation0] sm:$0x3] %v18_v4 }
  0x86   :  { %30 = dma.vmem_to_hbm [thread:$0]  %s26_s9, 32, %s28_s1, [#allocation1]  }
  0x87   :  { %60 = dma.done.wait [#allocation1], 32  }
  0x88   :  { %61 = vsyncadd [#allocation1], 4294967264 }
  0x89   :  { %33 = vsyncpa [#allocation1], 1 }

// kernel: pg_rank_nn_cross_forward.1
= control target key start
LH: loop header
LB: loop body
LE: loop exit
PB: predicated region body
PF: predicated region fallthrough
CT: control target
= control target key end

     0   :  { %v668_v0 = vmov 1   ;;  %v669_v7 = vmov 0   ;;  %vm94_vm0 = vcmask 261120   ;;  %v670_v17 = vmov 2   ;;  %s980_s4 = inlined_call_operand.vmem [shape: f32[32,4], index: 4, kind: input, shape index: {}]   ;;  %s981_s0 = inlined_call_operand.vmem [shape: f32[32,256], index: 0, kind: input, shape index: {}]   ;;  %s982_s1 = inlined_call_operand.vmem [shape: f32[32,32], index: 1, kind: input, shape index: {}]   ;;  %s983_s3 = inlined_call_operand.vmem [shape: f32[32,5], index: 3, kind: input, shape index: {}]   ;;  %s984_s5 = inlined_call_operand.vmem [shape: f32[1,8], index: 5, kind: input, shape index: {}]   ;;  %s985_s2 = inlined_call_operand.vmem [shape: f32[32,32], index: 2, kind: input, shape index: {}]   ;;  %s986_s6 = inlined_call_operand.vmem [shape: f32[1,256], index: 6, kind: output, shape index: {}]  }
   0x1   :  { %642 = vset.pattern.permute.xlu1 %v668_v0  ;;  %v37_v1 = vld [vmem:[%s980_s4 + $0x10] sm:$0xff]  ;;  %v722_v3 = vld [vmem:[%s981_s0 + $0x38] sm:$0xff]  ;;  %641 = vset.pattern.permute.xlu0 %v668_v0  ;;  %v729_v4 = vld [vmem:[%s981_s0 + $0x20] sm:$0xff]  ;;  %v671_v20 = vmov 3   ;;  %v672_v25 = vmov 4   ;;  %vm606_vm1 = vcmask 1040384  }
   0x2   :  { %v717_v2 = vld [vmem:[%s981_s0 + $0x30] sm:$0xff]  ;;  %78 = vperm.xlu1 %642, %v37_v1   ;;  %v734_v5 = vld [vmem:[%s981_s0 + $0x28] sm:$0xff]  ;;  %148 = vmatpush.msra.mxu1 %v722_v3  ;;  %v746_v8 = vld [vmem:[%s981_s0 + $0x18] sm:$0xff] }
   0x3   :  { %119 = vmatpush.msra.mxu0 %v717_v2  ;;  %v740_v6 = vld [vmem:[%s981_s0 + $0x10] sm:$0xff]  ;;  %643 = vset.pattern.permute.xlu2 %v669_v7  ;;  %v35_v9 = vld [vmem:[%s980_s4] sm:$0xff]  ;;  %v38_v11 = vld [vmem:[%s980_s4 + $0x18] sm:$0xff]  ;;  %v51_v28 = vmul.f32 %v722_v3, %v746_v8 }
   0x4   :  { %149 = vmatpush.msra.mxu1 %v734_v5  ;;  %v755_v10 = vld [vmem:[%s981_s0] sm:$0xff]  ;;  %68 = vperm.xlu0 %641, %v35_v9   ;;  %v764_v12 = vld [vmem:[%s981_s0 + $0x8] sm:$0xff]  ;;  %v25_v16 = vld [vmem:[%s982_s1 + $0x10] sm:$0xff]  ;;  %v50_v26 = vmul.f32 %v717_v2, %v740_v6 }
   0x5   :  { %120 = vmatpush.msra.mxu0 %v729_v4  ;;  %v23_v13 = vld [vmem:[%s982_s1] sm:$0xff]  ;;  %178 = vperm.xlu2 %643, %v38_v11   ;;  %v36_v14 = vld [vmem:[%s980_s4 + $0x8] sm:$0xff]  ;;  %v26_v19 = vld [vmem:[%s982_s1 + $0x18] sm:$0xff]  ;;  %v48_v27 = vmul.f32 %v729_v4, %v755_v10  ;;  %v49_v29 = vmul.f32 %v734_v5, %v764_v12 }
   0x6   :  { %150 = vmatpush.msra.mxu1 %v746_v8  ;;  %v24_v15 = vld [vmem:[%s982_s1 + $0x8] sm:$0xff]  ;;  %v31_v18 = vld [vmem:[%s983_s3] sm:$0xff]  ;;  %v33_v22 = vld [vmem:[%s983_s3 + $0x10] sm:$0xff] }
   0x7   :  { %121 = vmatpush.msra.mxu0 %v740_v6  ;;  %v32_v21 = vld [vmem:[%s983_s3 + $0x8] sm:$0xff]  ;;  %v34_v23 = vld [vmem:[%s983_s3 + $0x18] sm:$0xff]  ;;  %v808_v24 = vld [vmem:[%s984_s5] sm:$0x1]  ;;  %v52_v30 = vadd.f32 %v50_v26, %v48_v27  ;;  %v59_v31 = vadd.f32 %v51_v28, %v49_v29 }
   0x8   :  { %151 = vmatpush.msra.mxu1 %v764_v12 }
   0x9   :  { %122 = vmatpush.msra.mxu0 %v755_v10  ;;  %622 = vmatmul.msk.f32.vlgmr.msra.gmra.mxu1 %vm94_vm0, %v23_v13  ;;  %v53_v32 = vrot.slane %v52_v30, 4  ;;  %v60_v33 = vrot.slane %v59_v31, 4 }
   0xa   :  { %618 = vmatmul.msk.f32.vlgmr.msra.gmra.mxu0 %vm94_vm0, %v23_v13  ;;  %83 = vperm.xlu1 %642, %v38_v11  }
   0xb   :  { %v54_v35 = vadd.f32 %v53_v32, %v52_v30  ;;  %v61_v37 = vadd.f32 %v60_v33, %v59_v31 }
   0xc   :  { %73 = vperm.xlu0 %641, %v36_v14  }
   0xd   :  { %174 = vperm.xlu2 %643, %v37_v1   ;;  %v55_v39 = vrot.slane %v54_v35, 2  ;;  %v62_v40 = vrot.slane %v61_v37, 2 }
   0xf   :  { %v56_v43 = vadd.f32 %v55_v39, %v54_v35  ;;  %v63_v45 = vadd.f32 %v62_v40, %v61_v37 }
  0x11   :  { %623 = vmatmul.msk.f32.gmra.mxu1 %vm94_vm0, %v24_v15  ;;  %v57_v46 = vrot.slane %v56_v43, 1  ;;  %v64_v49 = vrot.slane %v63_v45, 1 }
  0x12   :  { %619 = vmatmul.msk.f32.gmra.mxu0 %vm94_vm0, %v24_v15  ;;  %645 = vset.pattern.permute.xlu1 %v669_v7 }
  0x13   :  { %166 = vperm.xlu1 %645, %v35_v9   ;;  %v825_v51 = vadd.f32 %v57_v46, %v56_v43  ;;  %v827_v54 = vadd.f32 %v64_v49, %v63_v45  ;;  %v29_v43 = vld [vmem:[%s985_s2 + $0x10] sm:$0xff]  ;;  %v30_v46 = vld [vmem:[%s985_s2 + $0x18] sm:$0xff] }
  0x14   :  { %644 = vset.pattern.permute.xlu0 %v669_v7 }
  0x15   :  { %170 = vperm.xlu0 %644, %v36_v14   ;;  %646 = vset.pattern.permute.xlu2 %v670_v17 }
  0x16   :  { %198 = vperm.xlu2 %646, %v35_v9  }
  0x19   :  { %624 = vmatmul.msk.f32.gmra.mxu1 %vm94_vm0, %v25_v16 }
  0x1a   :  { %620 = vmatmul.msk.f32.gmra.mxu0 %vm94_vm0, %v25_v16 }
  0x1b   :  { %647 = vset.pattern.permute.xlu1 %v670_v17 }
  0x1c   :  { %202 = vperm.xlu1 %647, %v36_v14  }
  0x1d   :  { %335 = vperm.xlu0 %644, %v31_v18  }
  0x1e   :  { %206 = vperm.xlu2 %646, %v37_v1  }
  0x21   :  { %625 = vmatmul.msk.f32.gmra.mxu1 %vm94_vm0, %v26_v19 }
  0x22   :  { %621 = vmatmul.msk.f32.gmra.mxu0 %vm94_vm0, %v26_v19 }
  0x24   :  { %648 = vset.pattern.permute.xlu1 %v671_v20 }
  0x25   :  { %292 = vperm.xlu1 %648, %v35_v9   ;;  %652 = vset.pattern.permute.xlu0 %v668_v0 }
  0x26   :  { %649 = vset.pattern.permute.xlu2 %v671_v20  ;;  %400 = vperm.xlu0 %652, %v31_v18  }
  0x27   :  { %296 = vperm.xlu2 %649, %v36_v14  }
  0x2d   :  { %300 = vperm.xlu1 %648, %v37_v1  }
  0x2e   :  { %653 = vset.pattern.permute.xlu0 %v670_v17 }
  0x2f   :  { %304 = vperm.xlu2 %649, %v38_v11   ;;  %210 = vperm.xlu0 %653, %v38_v11  }
  0x35   :  { %650 = vset.pattern.permute.xlu1 %v669_v7 }
  0x36   :  { %340 = vperm.xlu1 %650, %v32_v21  }
  0x37   :  { %651 = vset.pattern.permute.xlu2 %v669_v7  ;;  %433 = vperm.xlu0 %653, %v31_v18  }
  0x38   :  { %345 = vperm.xlu2 %651, %v33_v22  }
  0x3e   :  { %350 = vperm.xlu1 %650, %v34_v23  }
  0x3f   :  { %658 = vset.pattern.permute.xlu0 %v671_v20 }
  0x40   :  { %381 = vperm.xlu2 %651, %v808_v24   ;;  %492 = vperm.xlu0 %658, %v31_v18  }
  0x46   :  { %654 = vset.pattern.permute.xlu1 %v668_v0 }
  0x47   :  { %404 = vperm.xlu1 %654, %v32_v21  }
  0x48   :  { %655 = vset.pattern.permute.xlu2 %v668_v0  ;;  %662 = vset.pattern.permute.xlu0 %v672_v25 }
  0x49   :  { %408 = vperm.xlu2 %655, %v33_v22   ;;  %528 = vperm.xlu0 %662, %v32_v21  }
  0x4f   :  { %412 = vperm.xlu1 %654, %v34_v23  }
  0x51   :  { %426 = vperm.xlu2 %655, %v808_v24  }
  0x57   :  { %656 = vset.pattern.permute.xlu1 %v670_v17 }
  0x58   :  { %437 = vperm.xlu1 %656, %v32_v21  }
  0x59   :  { %657 = vset.pattern.permute.xlu2 %v670_v17 }
  0x5a   :  { %441 = vperm.xlu2 %657, %v33_v22  }
  0x5f   :  { %v179_v47 = vpop.permute.xlu2 %178 }
  0x60   :  { %445 = vperm.xlu1 %656, %v34_v23  }
  0x62   :  { %475 = vperm.xlu2 %657, %v808_v24  }
  0x67   :  { %v175_v59 = vpop.permute.xlu2 %174 }
  0x68   :  { %659 = vset.pattern.permute.xlu1 %v671_v20 }
  0x69   :  { %496 = vperm.xlu1 %659, %v32_v21  }
  0x6a   :  { %660 = vset.pattern.permute.xlu2 %v671_v20 }
  0x6b   :  { %500 = vperm.xlu2 %660, %v33_v22  }
  0x70   :  { %v837_v33 = vpop.permute.xlu2 %198 }
  0x71   :  { %504 = vperm.xlu1 %659, %v34_v23  }
  0x73   :  { %661 = vset.pattern.permute.xlu2 %v672_v25 }
  0x74   :  { %524 = vperm.xlu2 %661, %v31_v18   ;;  %v79_v38 = vpop.permute.xlu1 %78 }
  0x75   :  { %v90_v55 = vmul.f32 %v79_v38, %v825_v51  ;;  %v91_v56 = vmul.f32 %v79_v38, %v827_v54  ;;  %v27_v38 = vld [vmem:[%s985_s2] sm:$0xff] }
  0x76   :  { %v69_v41 = vpop.permute.xlu0 %68 }
  0x77   :  { %v86_v61 = vmul.f32 %v69_v41, %v825_v51  ;;  %v87_v1 = vmul.f32 %v69_v41, %v827_v54 }
  0x78   :  { %v846_v40 = vpop.permute.xlu2 %206 }
  0x79   :  { %663 = vset.pattern.permute.xlu1 %v672_v25 }
  0x7a   :  { %532 = vperm.xlu1 %663, %v33_v22  }
  0x7c   :  { %536 = vperm.xlu2 %661, %v34_v23   ;;  %v84_v48 = vpop.permute.xlu1 %83 }
  0x7d   :  { %v92_v60 = vmul.f32 %v84_v48, %v825_v51  ;;  %v93_v0 = vmul.f32 %v84_v48, %v827_v54 }
  0x7e   :  { %v74_v52 = vpop.permute.xlu0 %73 }
  0x7f   :  { %v88_v57 = vmul.f32 %v74_v52, %v825_v51  ;;  %v89_v58 = vmul.f32 %v74_v52, %v827_v54 }
  0x82   :  { %664 = vset.pattern.permute.xlu1 %v671_v20 }
  0x83   :  { %568 = vperm.xlu1 %664, %v808_v24  }
  0x84   :  { %579 = vperm.xlu2 %661, %v808_v24  }
  0x85   :  { %v167_v62 = vpop.permute.xlu1 %166 }
  0x86   :  { %v153_v36 = vpop.f32.mrf.mxu1 }
  0x87   :  { %v124_v34 = vpop.f32.mrf.mxu0  ;;  %v171_v18 = vpop.permute.xlu0 %170  ;;  %v154_v21 = vadd.f32 %v153_v36, %v87_v1 }
  0x88   :  { %v125_v17 = vadd.f32 %v124_v34, %v86_v61 }
  0x89   :  { %v182_v31 = vadd.f32 %v167_v62, %v154_v21 }
  0x8a   :  { %v181_v29 = vadd.f32 %v167_v62, %v125_v17 }
  0x8b   :  { %v190_v39 = vmax.f32 %v182_v31, 0.0 }
  0x8c   :  { %v189_v37 = vmax.f32 %v181_v29, 0.0 }
  0x8e   :  { %v156_v44 = vpop.f32.mrf.mxu1  ;;  %v839_v35 = vpop.permute.xlu1 %202 }
  0x8f   :  { %v127_v42 = vpop.f32.mrf.mxu0  ;;  %v157_v15 = vadd.f32 %v156_v44, %v89_v58  ;;  %v858_v44 = vpop.permute.xlu2 %296 }
  0x90   :  { %v128_v11 = vadd.f32 %v127_v42, %v88_v57  ;;  %v28_v42 = vld [vmem:[%s985_s2 + $0x8] sm:$0xff]  ;;  %v336_v49 = vpop.permute.xlu0 %335 }
  0x91   :  { %v184_v27 = vadd.f32 %v171_v18, %v157_v15  ;;  %v354_v57 = vmul.f32 %v336_v49, %v764_v12 }
  0x92   :  { %v183_v25 = vadd.f32 %v171_v18, %v128_v11 }
  0x93   :  { %v192_v36 = vmax.f32 %v184_v27, 0.0 }
  0x94   :  { %v191_v34 = vmax.f32 %v183_v25, 0.0 }
  0x96   :  { %v159_v53 = vpop.f32.mrf.mxu1 }
  0x97   :  { %v130_v50 = vpop.f32.mrf.mxu0  ;;  %v160_v7 = vadd.f32 %v159_v53, %v91_v56  ;;  %v848_v41 = vpop.permute.xlu1 %292  ;;  %v673_v53 = vmov 5  }
  0x98   :  { %v131_v63 = vadd.f32 %v130_v50, %v90_v55  ;;  %665 = vset.pattern.permute.xlu0 %v673_v53  ;;  %v353_v55 = vmul.f32 %v336_v49, %v755_v10  ;;  %v401_v27 = vpop.permute.xlu0 %400 }
  0x99   :  { %v186_v23 = vadd.f32 %v175_v59, %v160_v7  ;;  %588 = vperm.xlu0 %665, %v808_v24  }
  0x9a   :  { %v185_v20 = vadd.f32 %v175_v59, %v131_v63  ;;  %v674_v59 = vmov 6  }
  0x9b   :  { %v194_v32 = vmax.f32 %v186_v23, 0.0  ;;  %666 = vset.pattern.permute.xlu1 %v674_v59 }
  0x9c   :  { %v193_v30 = vmax.f32 %v185_v20, 0.0  ;;  %597 = vperm.xlu1 %666, %v808_v24  }
  0x9e   :  { %v162_v14 = vpop.f32.mrf.mxu1 }
  0x9f   :  { %v133_v9 = vpop.f32.mrf.mxu0  ;;  %v163_v16 = vadd.f32 %v162_v14, %v93_v0  ;;  %v860_v45 = vpop.permute.xlu1 %300 }
  0xa0   :  { %v134_v13 = vadd.f32 %v133_v9, %v92_v60 }
  0xa1   :  { %v188_v22 = vadd.f32 %v179_v47, %v163_v16  ;;  %667 = vset.pattern.permute.xlu0 %v674_v59 }
  0xa2   :  { %v187_v19 = vadd.f32 %v179_v47, %v134_v13  ;;  %v868_v47 = vpop.permute.xlu2 %304 }
  0xa3   :  { %v196_v28 = vmax.f32 %v188_v22, 0.0 }
  0xa4   :  { %v195_v26 = vmax.f32 %v187_v19, 0.0 }
  0xa5   :  { %266 = vmatpush.msra.mxu3 %v196_v28 }
  0xa6   :  { %237 = vmatpush.msra.mxu2 %v195_v26 }
  0xa7   :  { %267 = vmatpush.msra.mxu3 %v194_v32 }
  0xa8   :  { %238 = vmatpush.msra.mxu2 %v193_v30  ;;  %v341_v48 = vpop.permute.xlu1 %340 }
  0xa9   :  { %268 = vmatpush.msra.mxu3 %v192_v36  ;;  %v355_v50 = vmul.f32 %v341_v48, %v740_v6  ;;  %v356_v52 = vmul.f32 %v341_v48, %v746_v8 }
  0xaa   :  { %239 = vmatpush.msra.mxu2 %v191_v34  ;;  %v346_v56 = vpop.permute.xlu2 %345 }
  0xab   :  { %269 = vmatpush.msra.mxu3 %v190_v39  ;;  %v357_v60 = vmul.f32 %v346_v56, %v729_v4  ;;  %v361_v61 = vadd.f32 %v355_v50, %v353_v55  ;;  %v358_v62 = vmul.f32 %v346_v56, %v734_v5  ;;  %v370_v63 = vadd.f32 %v356_v52, %v354_v57 }
  0xac   :  { %240 = vmatpush.msra.mxu2 %v189_v37  ;;  %630 = vmatmul.msk.f32.vlgmr.msra.gmra.mxu3 %vm94_vm0, %v27_v38 }
  0xad   :  { %626 = vmatmul.msk.f32.vlgmr.msra.gmra.mxu2 %vm94_vm0, %v27_v38  ;;  %v362_v7 = vadd.f32 %v361_v61, %v357_v60  ;;  %v371_v9 = vadd.f32 %v370_v63, %v358_v62  ;;  %v883_v38 = vpop.permute.xlu0 %210 }
  0xb0   :  { %v351_v58 = vpop.permute.xlu1 %350 }
  0xb1   :  { %v359_v0 = vmul.f32 %v351_v58, %v717_v2  ;;  %v360_v1 = vmul.f32 %v351_v58, %v722_v3 }
  0xb2   :  { %v382_v21 = vpop.permute.xlu2 %381 }
  0xb3   :  { %v363_v11 = vadd.f32 %v362_v7, %v359_v0  ;;  %v372_v13 = vadd.f32 %v371_v9, %v360_v1  ;;  %v384_v23 = vperm.slane %v382_v21, 0 }
  0xb4   :  { %631 = vmatmul.msk.f32.gmra.mxu3 %vm94_vm0, %v28_v42 }
  0xb5   :  { %627 = vmatmul.msk.f32.gmra.mxu2 %vm94_vm0, %v28_v42  ;;  %v364_v14 = vrot.slane %v363_v11, 4  ;;  %v373_v15 = vrot.slane %v372_v13, 4  ;;  %v385_v28 = vmul.f32 %v384_v23, %v825_v51  ;;  %v386_v30 = vmul.f32 %v384_v23, %v827_v54  ;;  %v434_v60 = vpop.permute.xlu0 %433 }
  0xb7   :  { %v365_v16 = vadd.f32 %v364_v14, %v363_v11  ;;  %v374_v17 = vadd.f32 %v373_v15, %v372_v13 }
  0xb9   :  { %v366_v18 = vrot.slane %v365_v16, 2  ;;  %v375_v19 = vrot.slane %v374_v17, 2  ;;  %v405_v20 = vpop.permute.xlu1 %404 }
  0xba   :  { %v409_v34 = vpop.permute.xlu2 %408 }
  0xbb   :  { %v367_v24 = vadd.f32 %v366_v18, %v365_v16  ;;  %v376_v22 = vadd.f32 %v375_v19, %v374_v17 }
  0xbc   :  { %632 = vmatmul.msk.f32.gmra.mxu3 %vm94_vm0, %v29_v43 }
  0xbd   :  { %628 = vmatmul.msk.f32.gmra.mxu2 %vm94_vm0, %v29_v43  ;;  %v368_v25 = vrot.slane %v367_v24, 1  ;;  %v377_v26 = vrot.slane %v376_v22, 1 }
  0xbf   :  { %v369_v29 = vadd.f32 %v368_v25, %v367_v24  ;;  %v378_v31 = vadd.f32 %v377_v26, %v376_v22 }
  0xc1   :  { %v413_v32 = vpop.permute.xlu1 %412  ;;  %v387_v36 = vadd.f32 %v385_v28, %v369_v29  ;;  %v388_v37 = vadd.f32 %v386_v30, %v378_v31 }
  0xc2   :  { %v427_v49 = vpop.permute.xlu2 %426 }
  0xc3   :  { %v389_v39 = vadd.f32 1.0, %v387_v36  ;;  %v390_v42 = vadd.f32 1.0, %v388_v37 }
  0xc4   :  { %633 = vmatmul.msk.f32.gmra.mxu3 %vm94_vm0, %v30_v46 }
  0xc5   :  { %629 = vmatmul.msk.f32.gmra.mxu2 %vm94_vm0, %v30_v46  ;;  %v391_v46 = vmul.f32 %v389_v39, %v755_v10  ;;  %v393_v48 = vmul.f32 %v389_v39, %v740_v6  ;;  %v392_v50 = vmul.f32 %v390_v42, %v764_v12  ;;  %v394_v52 = vmul.f32 %v390_v42, %v746_v8 }
  0xc6   :  { %v395_v56 = vmul.f32 %v389_v39, %v729_v4  ;;  %v396_v59 = vmul.f32 %v390_v42, %v734_v5  ;;  %v397_v61 = vmul.f32 %v389_v39, %v717_v2  ;;  %v398_v63 = vmul.f32 %v390_v42, %v722_v3 }
  0xc7   :  { %v889_v53 = vadd.f32 %v401_v27, %v391_v46  ;;  %v891_v55 = vadd.f32 %v405_v20, %v393_v48  ;;  %v894_v57 = vadd.f32 %v401_v27, %v392_v50  ;;  %v896_v58 = vadd.f32 %v405_v20, %v394_v52 }
  0xc8   :  { %v903_v1 = vadd.f32 %v409_v34, %v395_v56  ;;  %v906_v9 = vadd.f32 %v409_v34, %v396_v59  ;;  %v909_v14 = vadd.f32 %v413_v32, %v397_v61  ;;  %v911_v17 = vadd.f32 %v413_v32, %v398_v63 }
  0xc9   :  { %v448_v7 = vmul.f32 %v434_v60, %v889_v53  ;;  %v449_v11 = vmul.f32 %v434_v60, %v894_v57  ;;  %v423_v37 = vmul.f32 %v389_v39, %v825_v51  ;;  %v424_v46 = vmul.f32 %v390_v42, %v827_v54 }
  0xca   :  { %v438_v43 = vpop.permute.xlu1 %437  ;;  %v442_v16 = vpop.permute.xlu2 %441 }
  0xcb   :  { %v450_v62 = vmul.f32 %v438_v43, %v891_v55  ;;  %v451_v0 = vmul.f32 %v438_v43, %v896_v58  ;;  %v452_v19 = vmul.f32 %v442_v16, %v903_v1  ;;  %v453_v24 = vmul.f32 %v442_v16, %v906_v9 }
  0xcc   :  { %v429_v43 = vperm.slane %v427_v49, 0  ;;  %v493_v49 = vpop.permute.xlu0 %492 }
  0xcd   :  { %v456_v15 = vadd.f32 %v450_v62, %v448_v7  ;;  %v465_v18 = vadd.f32 %v451_v0, %v449_v11 }
  0xce   :  { %v919_v56 = vadd.f32 %v429_v43, %v423_v37  ;;  %v921_v60 = vadd.f32 %v429_v43, %v424_v46 }
  0xcf   :  { %v457_v22 = vadd.f32 %v456_v15, %v452_v19  ;;  %v466_v23 = vadd.f32 %v465_v18, %v453_v24 }
  0xd2   :  { %v446_v13 = vpop.permute.xlu1 %445  ;;  %v476_v48 = vpop.permute.xlu2 %475 }
  0xd3   :  { %v454_v20 = vmul.f32 %v446_v13, %v909_v14  ;;  %v455_v21 = vmul.f32 %v446_v13, %v911_v17  ;;  %v478_v59 = vperm.slane %v476_v48, 0 }
  0xd5   :  { %v458_v25 = vadd.f32 %v457_v22, %v454_v20  ;;  %v467_v26 = vadd.f32 %v466_v23, %v455_v21  ;;  %v479_v0 = vmul.f32 %v478_v59, %v919_v56  ;;  %v480_v7 = vmul.f32 %v478_v59, %v921_v60 }
  0xd7   :  { %v459_v27 = vrot.slane %v458_v25, 4  ;;  %v468_v28 = vrot.slane %v467_v26, 4 }
  0xd9   :  { %v460_v29 = vadd.f32 %v459_v27, %v458_v25  ;;  %v469_v30 = vadd.f32 %v468_v28, %v467_v26  ;;  %v529_v28 = vpop.permute.xlu0 %528 }
  0xda   :  { %v501_v42 = vpop.permute.xlu2 %500 }
  0xdb   :  { %v461_v31 = vrot.slane %v460_v29, 2  ;;  %v470_v32 = vrot.slane %v469_v30, 2  ;;  %v497_v63 = vpop.permute.xlu1 %496 }
  0xdd   :  { %v462_v34 = vadd.f32 %v461_v31, %v460_v29  ;;  %v471_v36 = vadd.f32 %v470_v32, %v469_v30 }
  0xdf   :  { %v463_v50 = vrot.slane %v462_v34, 1  ;;  %v472_v52 = vrot.slane %v471_v36, 1 }
  0xe1   :  { %v464_v61 = vadd.f32 %v463_v50, %v462_v34  ;;  %v473_v62 = vadd.f32 %v472_v52, %v471_v36 }
  0xe2   :  { %v525_v27 = vpop.permute.xlu2 %524 }
  0xe3   :  { %v925_v11 = vadd.f32 %v479_v0, %v464_v61  ;;  %v927_v39 = vadd.f32 %v480_v7, %v473_v62  ;;  %v505_v19 = vpop.permute.xlu1 %504 }
  0xe5   :  { %v485_v13 = vmul.f32 %v925_v11, %v740_v6  ;;  %v483_v15 = vmul.f32 %v925_v11, %v755_v10  ;;  %v486_v16 = vmul.f32 %v927_v39, %v746_v8  ;;  %v484_v18 = vmul.f32 %v927_v39, %v764_v12 }
  0xe6   :  { %v487_v25 = vmul.f32 %v925_v11, %v729_v4  ;;  %v488_v6 = vmul.f32 %v927_v39, %v734_v5  ;;  %v489_v31 = vmul.f32 %v925_v11, %v717_v2  ;;  %v490_v4 = vmul.f32 %v927_v39, %v722_v3 }
  0xe7   :  { %v509_v20 = vadd.f32 %v497_v63, %v485_v13  ;;  %v507_v24 = vadd.f32 %v493_v49, %v483_v15  ;;  %v510_v21 = vadd.f32 %v497_v63, %v486_v16  ;;  %v508_v22 = vadd.f32 %v493_v49, %v484_v18 }
  0xe8   :  { %v511_v30 = vadd.f32 %v501_v42, %v487_v25  ;;  %v512_v32 = vadd.f32 %v501_v42, %v488_v6  ;;  %v513_v43 = vadd.f32 %v505_v19, %v489_v31  ;;  %v514_v48 = vadd.f32 %v505_v19, %v490_v4 }
  0xe9   :  { %v515_v10 = vadd.f32 %v507_v24, %v889_v53  ;;  %v517_v8 = vadd.f32 %v509_v20, %v891_v55  ;;  %v516_v12 = vadd.f32 %v508_v22, %v894_v57  ;;  %v518_v29 = vadd.f32 %v510_v21, %v896_v58 }
  0xea   :  { %v519_v57 = vadd.f32 %v511_v30, %v903_v1  ;;  %v520_v58 = vadd.f32 %v512_v32, %v906_v9  ;;  %v521_v61 = vadd.f32 %v513_v43, %v909_v14  ;;  %v537_v3 = vpop.permute.xlu2 %536  ;;  %v522_v62 = vadd.f32 %v514_v48, %v911_v17 }
  0xeb   :  { %v539_v34 = vmul.f32 %v525_v27, %v515_v10  ;;  %v541_v5 = vmul.f32 %v529_v28, %v517_v8  ;;  %v540_v36 = vmul.f32 %v525_v27, %v516_v12  ;;  %v542_v53 = vmul.f32 %v529_v28, %v518_v29 }
  0xec   :  { %v533_v37 = vpop.permute.xlu1 %532  ;;  %v545_v49 = vmul.f32 %v537_v3, %v521_v61  ;;  %v546_v16 = vmul.f32 %v537_v3, %v522_v62  ;;  %v566_v61 = vmul.f32 %v927_v39, %v827_v54 }
  0xed   :  { %v547_v50 = vadd.f32 %v541_v5, %v539_v34  ;;  %v543_v52 = vmul.f32 %v533_v37, %v519_v57  ;;  %v556_v2 = vadd.f32 %v542_v53, %v540_v36  ;;  %v544_v59 = vmul.f32 %v533_v37, %v520_v58 }
  0xef   :  { %v548_v63 = vadd.f32 %v547_v50, %v543_v52  ;;  %v557_v7 = vadd.f32 %v556_v2, %v544_v59  ;;  %v565_v52 = vmul.f32 %v925_v11, %v825_v51 }
  0xf1   :  { %v549_v19 = vadd.f32 %v548_v63, %v545_v49  ;;  %v558_v20 = vadd.f32 %v557_v7, %v546_v16 }
  0xf3   :  { %v550_v6 = vrot.slane %v549_v19, 4 }
  0xf5   :  { %v551_v31 = vadd.f32 %v550_v6, %v549_v19  ;;  %v569_v37 = vpop.permute.xlu1 %568 }
  0xf7   :  { %v552_v57 = vrot.slane %v551_v31, 2 }
  0xf9   :  { %v553_v50 = vadd.f32 %v552_v57, %v551_v31 }
  0xfb   :  { %v554_v49 = vrot.slane %v553_v50, 1 }
 0x12f   :  { %v271_v26 = vpop.f32.mrf.mxu3 }
 0x130   :  { %v242_v23 = vpop.f32.mrf.mxu2  ;;  %v272_v18 = vadd.f32 %v271_v26, %v837_v33 }
 0x131   :  { %v243_v13 = vadd.f32 %v242_v23, %v837_v33  ;;  %v559_v23 = vrot.slane %v558_v20, 4 }
 0x132   :  { %v284_v25 = vmax.f32 %v272_v18, 0.0 }
 0x133   :  { %v283_v21 = vmax.f32 %v243_v13, 0.0  ;;  %v560_v34 = vadd.f32 %v559_v23, %v558_v20 }
 0x134   :  { %v308_v28 = vmul.f32 %v848_v41, %v284_v25 }
 0x135   :  { %v307_v12 = vmul.f32 %v848_v41, %v283_v21  ;;  %v561_v41 = vrot.slane %v560_v34, 2 }
 0x137   :  { %v274_v46 = vpop.f32.mrf.mxu3  ;;  %v562_v59 = vadd.f32 %v561_v41, %v560_v34 }
 0x138   :  { %v245_v55 = vpop.f32.mrf.mxu2  ;;  %v275_v42 = vadd.f32 %v274_v46, %v839_v35 }
 0x139   :  { %v246_v0 = vadd.f32 %v245_v55, %v839_v35 }
 0x13a   :  { %v286_v24 = vmax.f32 %v275_v42, 0.0 }
 0x13b   :  { %v285_v17 = vmax.f32 %v246_v0, 0.0  ;;  %v580_v0 = vpop.permute.xlu2 %579 }
 0x13c   :  { %v310_v8 = vmul.f32 %v858_v44, %v286_v24  ;;  %v582_v16 = vperm.slane %v580_v0, 0 }
 0x13d   :  { %v309_v10 = vmul.f32 %v858_v44, %v285_v17  ;;  %v555_v17 = vadd.f32 %v554_v49, %v553_v50 }
 0x13e   :  { %v324_v5 = vadd.f32 %v310_v8, %v308_v28 }
 0x13f   :  { %v277_v15 = vpop.f32.mrf.mxu3  ;;  %v315_v32 = vadd.f32 %v309_v10, %v307_v12  ;;  %v609_v12 = vlaneseq }
 0x140   :  { %v248_v1 = vpop.f32.mrf.mxu2  ;;  %v278_v14 = vadd.f32 %v277_v15, %v846_v40 }
 0x141   :  { %v249_v9 = vadd.f32 %v248_v1, %v846_v40  ;;  %v589_v1 = vpop.permute.xlu0 %588  ;;  %vm611_vm2 = vcmp.lt.s32.totalorder %v609_v12, 256 }
 0x142   :  { %v288_v35 = vmax.f32 %v278_v14, 0.0  ;;  %v591_v19 = vperm.slane %v589_v1, 0 }
 0x143   :  { %v287_v22 = vmax.f32 %v249_v9, 0.0  ;;  %v563_v9 = vrot.slane %v562_v59, 1 }
 0x144   :  { %v312_v29 = vmul.f32 %v860_v45, %v288_v35  ;;  %v592_v6 = vmul.f32 %v591_v19, %v825_v51  ;;  %v593_v10 = vmul.f32 %v591_v19, %v827_v54 }
 0x145   :  { %v311_v33 = vmul.f32 %v860_v45, %v287_v22  ;;  %v571_v45 = vperm.slane %v569_v37, 0  ;;  %v564_v24 = vadd.f32 %v563_v9, %v562_v59  ;;  %v598_v22 = vpop.permute.xlu1 %597 }
 0x146   :  { %v325_v55 = vadd.f32 %v324_v5, %v312_v29 }
 0x147   :  { %v280_v26 = vpop.f32.mrf.mxu3  ;;  %v316_v36 = vadd.f32 %v315_v32, %v311_v33  ;;  %v572_v62 = vadd.f32 %v571_v45, %v565_v52 }
 0x148   :  { %v251_v27 = vpop.f32.mrf.mxu2  ;;  %v281_v30 = vadd.f32 %v280_v26, %v883_v38 }
 0x149   :  { %v252_v40 = vadd.f32 %v251_v27, %v883_v38  ;;  %v574_v15 = vadd.f32 %v572_v62, %v919_v56  ;;  %v600_v27 = vperm.slane %v598_v22, 0 }
 0x14a   :  { %v290_v44 = vmax.f32 %v281_v30, 0.0 }
 0x14b   :  { %v289_v4 = vmax.f32 %v252_v40, 0.0  ;;  %v583_v21 = vmul.f32 %v582_v16, %v574_v15 }
 0x14c   :  { %v314_v43 = vmul.f32 %v868_v47, %v290_v44 }
 0x14d   :  { %v313_v53 = vmul.f32 %v868_v47, %v289_v4  ;;  %v573_v47 = vadd.f32 %v571_v45, %v566_v61 }
 0x14e   :  { %v326_v48 = vadd.f32 %v325_v55, %v314_v43 }
 0x14f   :  { %v317_v46 = vadd.f32 %v316_v36, %v313_v53  ;;  %v575_v18 = vadd.f32 %v573_v47, %v921_v60 }
 0x150   :  { %v327_v38 = vrot.slane %v326_v48, 4 }
 0x151   :  { %v318_v58 = vrot.slane %v317_v46, 4  ;;  %v584_v35 = vmul.f32 %v582_v16, %v575_v18 }
 0x152   :  { %v328_v3 = vadd.f32 %v327_v38, %v326_v48 }
 0x153   :  { %v319_v2 = vadd.f32 %v318_v58, %v317_v46 }
 0x154   :  { %v329_v7 = vrot.slane %v328_v3, 2 }
 0x155   :  { %v320_v63 = vrot.slane %v319_v2, 2 }
 0x156   :  { %v330_v13 = vadd.f32 %v329_v7, %v328_v3 }
 0x157   :  { %v321_v42 = vadd.f32 %v320_v63, %v319_v2 }
 0x158   :  { %v331_v14 = vrot.slane %v330_v13, 1 }
 0x159   :  { %v322_v11 = vrot.slane %v321_v42, 1 }
 0x15a   :  { %v332_v20 = vadd.f32 %v331_v14, %v330_v13 }
 0x15b   :  { %v323_v39 = vadd.f32 %v322_v11, %v321_v42 }
 0x15c   :  { %v577_v23 = vadd.f32 %v564_v24, %v332_v20 }
 0x15d   :  { %v576_v25 = vadd.f32 %v555_v17, %v323_v39 }
 0x15e   :  { %v586_v8 = vadd.f32 %v584_v35, %v577_v23 }
 0x15f   :  { %v585_v56 = vadd.f32 %v583_v21, %v576_v25 }
 0x160   :  { %v595_v33 = vadd.f32 %v593_v10, %v586_v8 }
 0x161   :  { %v594_v60 = vadd.f32 %v592_v6, %v585_v56 }
 0x162   :  { %v602_v40 = vadd.f32 %v600_v27, %v595_v33 }
 0x163   :  { %v601_v26 = vadd.f32 %v600_v27, %v594_v60 }
 0x164   :  { %v605_v28 = vrot.slane %v602_v40, 7 }
 0x166   :  { %v607_v29 = vsel %vm606_vm1, %v601_v26, %v605_v28 }
 0x167   :  { %613 = vst.msk [vmem:[%s986_s6] sm:$0x3] %vm611_vm2, %v607_v29 }

</bundles_post_ra>
